<compile_context>
chip_gen: v5e
topology: v5e:2x2
jax: 0.10.0
libtpu: 0.0.40
codegen_flags: <defaults>
</compile_context>

<pallas_src>
import jax
import jax.numpy as jnp
from jax.experimental import pallas as pl
from jax.experimental.pallas import tpu as pltpu

HIDDEN = 64          # hidden width fixed by the module (64 per GCNConv layer)
_MARGIN = 8 << 20    # VMEM slack for compiler-internal scratch


def _round_up(x: int, m: int) -> int:
    return ((x + m - 1) // m) * m


def _vmem_budget() -> int:
    """Generation-aware VMEM budget (conservative v7x fallback)."""
    try:
        cap = int(pltpu.get_tpu_info().vmem_capacity_bytes)
    except Exception:
        cap = 64 << 20
    return max(32 << 20, min(int(cap * 0.6), 96 << 20))


def _pick_tiling(n: int):
    """(row tile, K tile, padded node count).  VMEM need is independent of
    n_pad thanks to K-tiling, so the fallback (tk = tm) always fits."""
    budget = _vmem_budget()
    n_base = _round_up(max(n, 128), 128)
    tm = 512 if n_base >= 512 else n_base
    n_pad = _round_up(n_base, tm)

    def fits(tk):
        need = (2 * tm * tk * 2            # streamed A tile (bf16, 2 buffers)
                + 2 * tk * HIDDEN * 2      # streamed XW tile (bf16, 2 buffers)
                + 2 * tm * HIDDEN * 2      # output tile (bf16, 2 buffers)
                + tm * HIDDEN * 4          # f32 accumulator scratch
                + 2 * HIDDEN * HIDDEN * 2  # resident W_next
                + 2 * HIDDEN * 4)          # resident bias
        return need + _MARGIN <= budget

    tk = tm                                 # always fits (≈1 MiB)
    for cand in (n_pad, 16384, 8192, 4096, 2048, 1024, 512, 256, 128):
        if cand <= n_pad and n_pad % cand == 0 and fits(cand):
            tk = cand
            break
    return tm, tk, n_pad


def _pick_pool_tile(n_pad: int, g_pad: int, o_pad: int) -> int:
    budget = _vmem_budget()

    def fits(tn):
        need = (2 * g_pad * tn * 2 + 2 * tn * HIDDEN * 2 + g_pad * HIDDEN * 4
                + 2 * HIDDEN * o_pad * 4 + 2 * o_pad * 4 + 2 * g_pad * o_pad * 4)
        return need + _MARGIN <= budget

    for cand in (n_pad, 16384, 8192, 4096, 2048, 1024, 512, 256, 128):
        if cand <= n_pad and n_pad % cand == 0 and fits(cand):
            return cand
    return 128


# ---------------------------------------------------------------------------
# Kernel 1 (layer 0 only): feature transform  XW0 = H0 @ W0  (bf16 in/out)
# ---------------------------------------------------------------------------
def _xw_kernel(h_ref, w_ref, xw_ref):
    xw_ref[...] = jnp.dot(h_ref[...], w_ref[...],
                          preferred_element_type=jnp.float32).astype(xw_ref.dtype)


def _feature_transform(h_bf16, w_bf16, *, tm):
    n_pad, f_in = h_bf16.shape
    f_out = w_bf16.shape[1]
    need = 2 * tm * f_in * 2 + 2 * f_in * f_out * 2 + 2 * tm * f_out * 2
    return pl.pallas_call(
        _xw_kernel,
        out_shape=jax.ShapeDtypeStruct((n_pad, f_out), jnp.bfloat16),
        grid_spec=pltpu.PrefetchScalarGridSpec(
            num_scalar_prefetch=0,
            grid=(n_pad // tm,),
            in_specs=[pl.BlockSpec((tm, f_in), lambda i: (i, 0)),
                      pl.BlockSpec((f_in, f_out), lambda i: (0, 0))],   # resident
            out_specs=pl.BlockSpec((tm, f_out), lambda i: (i, 0))),
        compiler_params=pltpu.CompilerParams(
            dimension_semantics=("parallel",),
            vmem_limit_bytes=int(need + _MARGIN)),
        cost_estimate=pl.CostEstimate(
            flops=int(2 * n_pad * f_in * f_out),
            transcendentals=0,
            bytes_accessed=int(2 * n_pad * f_in + 2 * f_in * f_out
                               + 2 * n_pad * f_out)),
    )(h_bf16, w_bf16)


# ---------------------------------------------------------------------------
# Kernel 2: fused aggregation.  Per row tile and K tile:
#   acc += A_hat[i, k] @ XW[k]          (bf16 MXU, f32 accumulate)
# epilogue (last k):
#   fused variant:  out = ((acc + b) @ W_next).astype(bf16)   -> next layer XW
#   last  variant:  out = (acc + b).astype(bf16)              -> final H
# ---------------------------------------------------------------------------
def _agg_fused_kernel(a_ref, xw_ref, b_ref, wn_ref, out_ref, acc_ref):
    k = pl.program_id(1)

    @pl.when(k == 0)
    def _():
        acc_ref[...] = jnp.zeros_like(acc_ref)

    acc_ref[...] += jnp.dot(a_ref[...], xw_ref[...],
                            preferred_element_type=jnp.float32)

    @pl.when(k == pl.num_programs(1) - 1)
    def _():
        h = (acc_ref[...] + b_ref[...]).astype(jnp.bfloat16)
        out_ref[...] = jnp.dot(h, wn_ref[...],
                               preferred_element_type=jnp.float32
                               ).astype(out_ref.dtype)


def _agg_last_kernel(a_ref, xw_ref, b_ref, out_ref, acc_ref):
    k = pl.program_id(1)

    @pl.when(k == 0)
    def _():
        acc_ref[...] = jnp.zeros_like(acc_ref)

    acc_ref[...] += jnp.dot(a_ref[...], xw_ref[...],
                            preferred_element_type=jnp.float32)

    @pl.when(k == pl.num_programs(1) - 1)
    def _():
        out_ref[...] = (acc_ref[...] + b_ref[...]).astype(out_ref.dtype)


def _aggregate(a_hat_bf16, xw_bf16, b_f32, w_next_bf16, *, tm, tk):
    n_pad = a_hat_bf16.shape[0]
    f = xw_bf16.shape[1]
    fused = w_next_bf16 is not None

    need = (2 * tm * tk * 2 + 2 * tk * f * 2 + 2 * tm * f * 2
            + tm * f * 4 + 2 * f * 4
            + (2 * f * w_next_bf16.shape[1] * 2 if fused else 0))

    in_specs = [pl.BlockSpec((tm, tk), lambda i, k: (i, k)),   # streamed A
                pl.BlockSpec((tk, f), lambda i, k: (k, 0)),    # streamed XW
                pl.BlockSpec((1, f), lambda i, k: (0, 0))]     # resident bias
    args = [a_hat_bf16, xw_bf16, b_f32]
    if fused:
        f_out = w_next_bf16.shape[1]
        in_specs.append(pl.BlockSpec((f, f_out), lambda i, k: (0, 0)))  # W_next
        args.append(w_next_bf16)
        kernel = _agg_fused_kernel
        flops = 2 * n_pad * n_pad * f + 2 * n_pad * f * f_out
    else:
        f_out = f
        kernel = _agg_last_kernel
        flops = 2 * n_pad * n_pad * f
    bytes_acc = (2 * n_pad * n_pad                       # A_hat stream (bf16)
                 + (n_pad // tm) * n_pad * f * 2         # XW re-stream per stripe
                 + n_pad * f_out * 2)                    # bf16 output

    return pl.pallas_call(
        kernel,
        out_shape=jax.ShapeDtypeStruct((n_pad, f_out), jnp.bfloat16),
        grid_spec=pltpu.PrefetchScalarGridSpec(
            num_scalar_prefetch=0,
            grid=(n_pad // tm, n_pad // tk),
            in_specs=in_specs,
            out_specs=pl.BlockSpec((tm, f_out), lambda i, k: (i, 0)),
            scratch_shapes=[pltpu.VMEM((tm, f), jnp.float32)]),
        compiler_params=pltpu.CompilerParams(
            dimension_semantics=("parallel", "arbitrary"),
            vmem_limit_bytes=int(need + _MARGIN)),
        cost_estimate=pl.CostEstimate(flops=int(flops), transcendentals=0,
                                      bytes_accessed=int(bytes_acc)),
    )(*args)


# ---------------------------------------------------------------------------
# Kernel 3: epilogue  out = (P @ H) @ W_lin + b_lin, reduction-tiled over nodes
# ---------------------------------------------------------------------------
def _pool_linear_kernel(p_ref, h_ref, wl_ref, bl_ref, out_ref, acc_ref):
    k = pl.program_id(0)

    @pl.when(k == 0)
    def _():
        acc_ref[...] = jnp.zeros_like(acc_ref)

    acc_ref[...] += jnp.dot(p_ref[...], h_ref[...],
                            preferred_element_type=jnp.float32)

    @pl.when(k == pl.num_programs(0) - 1)
    def _():
        out_ref[...] = jnp.dot(acc_ref[...], wl_ref[...],
                               preferred_element_type=jnp.float32) + bl_ref[...]


def _pool_linear(p_bf16, h_bf16, w_lin_pad, b_lin_pad, *, tn):
    g_pad, n_pad = p_bf16.shape
    f = h_bf16.shape[1]
    o_pad = w_lin_pad.shape[1]
    need = (2 * g_pad * tn * 2 + 2 * tn * f * 2 + g_pad * f * 4
            + 2 * f * o_pad * 4 + 2 * o_pad * 4 + 2 * g_pad * o_pad * 4)
    return pl.pallas_call(
        _pool_linear_kernel,
        out_shape=jax.ShapeDtypeStruct((g_pad, o_pad), jnp.float32),
        grid_spec=pltpu.PrefetchScalarGridSpec(
            num_scalar_prefetch=0,
            grid=(n_pad // tn,),
            in_specs=[pl.BlockSpec((g_pad, tn), lambda k: (0, k)),
                      pl.BlockSpec((tn, f), lambda k: (k, 0)),
                      pl.BlockSpec((f, o_pad), lambda k: (0, 0)),
                      pl.BlockSpec((1, o_pad), lambda k: (0, 0))],
            out_specs=pl.BlockSpec((g_pad, o_pad), lambda k: (0, 0)),
            scratch_shapes=[pltpu.VMEM((g_pad, f), jnp.float32)]),
        compiler_params=pltpu.CompilerParams(
            dimension_semantics=("arbitrary",),
            vmem_limit_bytes=int(need + _MARGIN)),
        cost_estimate=pl.CostEstimate(
            flops=int(2 * g_pad * n_pad * f + 2 * g_pad * f * o_pad),
            transcendentals=0,
            bytes_accessed=int(2 * g_pad * n_pad + 2 * n_pad * f
                               + 4 * g_pad * o_pad)),
    )(p_bf16, h_bf16, w_lin_pad, b_lin_pad)


# ---------------------------------------------------------------------------
# Forward wrapper
# ---------------------------------------------------------------------------
def gcn_forward(x, edge_index, batch_indexes, params, num_graphs):
    n = x.shape[0]
    tm, tk, n_pad = _pick_tiling(n)

    # --- glue: dense normalized adjacency A_hat = D^{-1/2}(A+I)D^{-1/2} ---
    # Scale + cast to bf16 BEFORE padding (no padded f32 N_pad^2 intermediate).
    # TODO(synk): for large sparse graphs replace this dense O(N^2) A_hat with a
    # CSR/block-sparse layout + scalar-prefetched gather; an int8/fp8-with-scale
    # A_hat stream would halve HBM bytes again but needs numerical revalidation.
    src, dst = edge_index[0], edge_index[1]
    a = jnp.zeros((n, n), jnp.float32).at[dst, src].add(1.0)
    a = a + jnp.eye(n, dtype=jnp.float32)              # self loops
    deg = a.sum(axis=1)
    dinv = jnp.where(deg > 0, jax.lax.rsqrt(deg), 0.0)
    a_hat = (dinv[:, None] * a * dinv[None, :]).astype(jnp.bfloat16)
    a_hat = jnp.pad(a_hat, ((0, n_pad - n), (0, n_pad - n)))

    # --- glue: mean-pool matrix P [G_pad, N_pad] (zero cols for pad nodes) ---
    g_pad = _round_up(max(num_graphs, 8), 8)
    onehot = (batch_indexes[None, :] ==
              jnp.arange(num_graphs)[:, None]).astype(jnp.float32)
    counts = onehot.sum(axis=1, keepdims=True)
    p = (onehot / jnp.maximum(counts, 1.0)).astype(jnp.bfloat16)
    p = jnp.pad(p, ((0, g_pad - num_graphs), (0, n_pad - n)))

    # --- GCNConv layers ---
    # One feature-transform kernel for layer 0, then one fused aggregation
    # kernel per layer (bias + next layer's W folded into the epilogue).
    # NOTE: after the fused epilogue, padded ROWS of the intermediate equal the
    # layer bias (not zero); harmless because padded COLUMNS of A_hat and P are
    # zero, but downstream consumers must not assume zero row padding.
    ws = [w.astype(jnp.bfloat16) for w in params["layer_ws"]]
    bs = [b.astype(jnp.float32).reshape(1, -1) for b in params["layer_bs"]]
    n_layers = len(ws)

    h0 = jnp.pad(x.astype(jnp.bfloat16), ((0, n_pad - n), (0, 0)))
    xw = _feature_transform(h0, ws[0], tm=tm)
    h_out = None
    for l in range(n_layers):
        w_next = ws[l + 1] if l + 1 < n_layers else None
        res = _aggregate(a_hat, xw, bs[l], w_next, tm=tm, tk=tk)
        if w_next is None:
            h_out = res
        else:
            xw = res

    # --- pooling + final Linear, lane-dense padded output ---
    w_lin = params["w_lin"].astype(jnp.float32)
    b_lin = params["b_lin"].astype(jnp.float32)
    out_size = w_lin.shape[1]
    o_pad = _round_up(max(out_size, 128), 128)
    w_lin_pad = jnp.pad(w_lin, ((0, 0), (0, o_pad - out_size)))
    b_lin_pad = jnp.pad(b_lin, (0, o_pad - out_size)).reshape(1, -1)

    tn = _pick_pool_tile(n_pad, g_pad, o_pad)
    out_pad = _pool_linear(p, h_out, w_lin_pad, b_lin_pad, tn=tn)
    return out_pad[:num_graphs, :out_size]


def init_params(key, input_size, num_hidden_layers, output_size):
    """Deterministic glorot-ish init matching the module's parameter shapes."""
    complete_sizes = (input_size,) + tuple(HIDDEN for _ in range(num_hidden_layers))
    layer_ws, layer_bs = [], []
    for i in range(len(complete_sizes) - 1):
        key, kw = jax.random.split(key)
        fan_in, fan_out = complete_sizes[i], complete_sizes[i + 1]
        scale = (6.0 / (fan_in + fan_out)) ** 0.5
        layer_ws.append(jax.random.uniform(kw, (fan_in, fan_out), jnp.float32,
                                           -scale, scale))
        layer_bs.append(jnp.zeros((fan_out,), jnp.float32))
    key, kl = jax.random.split(key)
    scale = (6.0 / (HIDDEN + output_size)) ** 0.5
    w_lin = jax.random.uniform(kl, (HIDDEN, output_size), jnp.float32,
                               -scale, scale)
    b_lin = jnp.zeros((output_size,), jnp.float32)
    return {"layer_ws": layer_ws, "layer_bs": layer_bs,
            "w_lin": w_lin, "b_lin": b_lin}


def _reference_forward(x, edge_index, batch_indexes, params, num_graphs):
    """Pure-JAX f32 reference of the same dense GCN math."""
    n = x.shape[0]
    src, dst = edge_index[0], edge_index[1]
    a = jnp.zeros((n, n), jnp.float32).at[dst, src].add(1.0)
    a = a + jnp.eye(n, dtype=jnp.float32)
    deg = a.sum(axis=1)
    dinv = jnp.where(deg > 0, jax.lax.rsqrt(deg), 0.0)
    a_hat = dinv[:, None] * a * dinv[None, :]
    h = x.astype(jnp.float32)
    for w, b in zip(params["layer_ws"], params["layer_bs"]):
        h = a_hat @ (h @ w) + b[None, :]
    onehot = (batch_indexes[None, :] ==
              jnp.arange(num_graphs)[:, None]).astype(jnp.float32)
    p = onehot / jnp.maximum(onehot.sum(axis=1, keepdims=True), 1.0)
    return p @ h @ params["w_lin"] + params["b_lin"][None, :]


if __name__ == "__main__":
    key = jax.random.PRNGKey(0)

    # Small synthetic graph batch: 2 graphs of 8 nodes each (N = 16 nodes).
    input_size = 8
    num_hidden_layers = 2
    output_size = 3
    n_nodes = 16
    num_graphs = 2

    key, kx = jax.random.split(key)
    x = jax.random.normal(kx, (n_nodes, input_size), jnp.float32)

    # Ring edges inside each graph (bidirectional), no self loops.
    edges = []
    for g in range(num_graphs):
        base = g * 8
        for i in range(8):
            a_node = base + i
            b_node = base + (i + 1) % 8
            edges.append((a_node, b_node))
            edges.append((b_node, a_node))
    edge_index = jnp.array(edges, dtype=jnp.int32).T        # [2, 32]

    batch_indexes = jnp.concatenate(
        [jnp.zeros((8,), jnp.int32), jnp.ones((8,), jnp.int32)])

    params = init_params(key, input_size, num_hidden_layers, output_size)

    out = gcn_forward(x, edge_index, batch_indexes, params, num_graphs)
    out = jax.block_until_ready(out)
    assert out.shape == (num_graphs, output_size)
    assert bool(jnp.all(jnp.isfinite(out)))

    ref = _reference_forward(x, edge_index, batch_indexes, params, num_graphs)
    assert bool(jnp.allclose(out, ref, atol=1e-1, rtol=1e-1)), (out, ref)

    print("KERNEL_OK")
</pallas_src>

<mosaic_0001>
module attributes {stable_mosaic.version = 11 : i64} {
  func.func @_xw_kernel(%arg0: i32, %arg1: memref<128x8xbf16, #tpu.memory_space<vmem>>, %arg2: memref<8x64xbf16, #tpu.memory_space<vmem>>, %arg3: memref<128x64xbf16, #tpu.memory_space<vmem>>) attributes {dimension_semantics = [#tpu.dimension_semantics<parallel>], iteration_bounds = array<i64: 1>, scalar_prefetch = 0 : i64, scratch_operands = 0 : i64, tpu.core_type = #tpu.core_type<tc>, window_params = [{transform_indices = @transform_0, window_bounds = array<i64: 128, 8>}, {pipeline_mode = #tpu.pipeline_mode<synchronous>, transform_indices = @transform_1, window_bounds = array<i64: 8, 64>}, {transform_indices = @transform_2, window_bounds = array<i64: 128, 64>}]} {
    %c0 = arith.constant 0 : index
    %c0_0 = arith.constant 0 : index
    %0 = vector.load %arg1[%c0, %c0_0] : memref<128x8xbf16, #tpu.memory_space<vmem>>, vector<128x8xbf16>
    %c0_1 = arith.constant 0 : index
    %c0_2 = arith.constant 0 : index
    %1 = vector.load %arg2[%c0_1, %c0_2] : memref<8x64xbf16, #tpu.memory_space<vmem>>, vector<8x64xbf16>
    %cst = arith.constant dense<0.000000e+00> : vector<128x64xf32>
    %2 = tpu.matmul %0, %1, %cst {dimension_numbers = #tpu.dot_dimension_numbers<[1], [0], [0], [1], [0, 0, 1, 1], [], []>} : vector<128x8xbf16>, vector<8x64xbf16>, vector<128x64xf32> -> vector<128x64xf32>
    %3 = arith.truncf %2 : vector<128x64xf32> to vector<128x64xbf16>
    %c0_3 = arith.constant 0 : index
    %c0_4 = arith.constant 0 : index
    %4 = vector.load %arg3[%c0_3, %c0_4] : memref<128x64xbf16, #tpu.memory_space<vmem>>, vector<128x64xbf16>
    tpu.vector_store %arg3[%c0_3, %c0_4], %3 {strides = array<i32>} : memref<128x64xbf16, #tpu.memory_space<vmem>>, vector<128x64xbf16>,
    return
  }
  func.func @transform_0(%arg0: i32) -> (i32, i32) {
    %c0_i32 = arith.constant 0 : i32
    %c0_i32_0 = arith.constant 0 : i32
    return %arg0, %c0_i32 : i32, i32
  }
  func.func @transform_1(%arg0: i32) -> (i32, i32) {
    %c0_i32 = arith.constant 0 : i32
    %c0_i32_0 = arith.constant 0 : i32
    %c0_i32_1 = arith.constant 0 : i32
    return %c0_i32, %c0_i32_0 : i32, i32
  }
  func.func @transform_2(%arg0: i32) -> (i32, i32) {
    %c0_i32 = arith.constant 0 : i32
    %c0_i32_0 = arith.constant 0 : i32
    return %arg0, %c0_i32 : i32, i32
  }
}

</mosaic_0001>

<bundles_post_ra>
// kernel: tpu_custom_call.1
= control target key start
LH: loop header
LB: loop body
LE: loop exit
PB: predicated region body
PF: predicated region fallthrough
CT: control target
= control target key end

     0   :  { %vm94_vm0 = vcmask 1043456   ;;  %vm69_vm1 = vcmask 64512   ;;  %vm163_vm2 = vcmask 519168   ;;  %s349_s1 = inlined_call_operand.vmem [shape: bf16[8,64], index: 1, kind: input, shape index: {}]   ;;  %s350_s0 = inlined_call_operand.vmem [shape: bf16[128,8], index: 0, kind: input, shape index: {}]   ;;  %s351_s2 = inlined_call_operand.vmem [shape: bf16[128,64], index: 2, kind: output, shape index: {}]  }
   0x1   :  { %v28_v0 = vld [vmem:[%s349_s1] sm:$0xf]  ;;  %v226_v3 = vld [vmem:[%s350_s0 + $0x10] sm:$0xff]  ;;  %v225_v6 = vld [vmem:[%s350_s0 + $0x8] sm:$0xff] }
   0x2   :  { %v96_v1 = vsel %vm94_vm0, %v28_v0, 0  ;;  %v224_v2 = vld [vmem:[%s350_s0] sm:$0xff]  ;;  %v230_v5 = vld [vmem:[%s350_s0 + $0x30] sm:$0xff]  ;;  %v227_v7 = vld [vmem:[%s350_s0 + $0x18] sm:$0xff] }
   0x3   :  { %105 = vmatpush.bf16.msra.mxu0 %v96_v1  ;;  %232 = vmatpush.bf16.msra.mxu1 %v96_v1  ;;  %v228_v4 = vld [vmem:[%s350_s0 + $0x20] sm:$0xff]  ;;  %v229_v8 = vld [vmem:[%s350_s0 + $0x28] sm:$0xff]  ;;  %v231_v9 = vld [vmem:[%s350_s0 + $0x38] sm:$0xff] }
   0x4   :  { %233 = vmatpush.bf16.msra.mxu2 %v96_v1  ;;  %234 = vmatpush.bf16.msra.mxu3 %v96_v1 }
   0x6   :  { %216 = vmatmul.msk.bf16.vlgmr.msra.gmra.mxu0 %vm69_vm1, %v224_v2  ;;  %218 = vmatmul.msk.bf16.vlgmr.msra.gmra.mxu1 %vm69_vm1, %v226_v3 }
   0x7   :  { %220 = vmatmul.msk.bf16.vlgmr.msra.gmra.mxu2 %vm69_vm1, %v228_v4  ;;  %222 = vmatmul.msk.bf16.vlgmr.msra.gmra.mxu3 %vm69_vm1, %v230_v5 }
  0x16   :  { %217 = vmatmul.msk.bf16.gmra.mxu0 %vm69_vm1, %v225_v6  ;;  %219 = vmatmul.msk.bf16.gmra.mxu1 %vm69_vm1, %v227_v7 }
  0x17   :  { %221 = vmatmul.msk.bf16.gmra.mxu2 %vm69_vm1, %v229_v8  ;;  %223 = vmatmul.msk.bf16.gmra.mxu3 %vm69_vm1, %v231_v9 }
  0x83   :  { %v107_v10 = vpop.f32.mrf.mxu0  ;;  %v117_v11 = vpop.f32.mrf.mxu1 }
  0x84   :  { %v147_v12 = vpack.c.bf16 %v107_v10, %v107_v10  ;;  %v151_v13 = vpack.c.bf16 %v117_v11, %v117_v11 }
  0x86   :  { %164 = vst.msk [vmem:[%s351_s2] sm:$0xf] %vm163_vm2, %v147_v12 }
  0x87   :  { %168 = vst.msk [vmem:[%s351_s2 + $0x10] sm:$0xf] %vm163_vm2, %v151_v13 }
  0x8a   :  { %v127_v14 = vpop.f32.mrf.mxu2  ;;  %v137_v15 = vpop.f32.mrf.mxu3 }
  0x8b   :  { %v155_v16 = vpack.c.bf16 %v127_v14, %v127_v14  ;;  %v159_v17 = vpack.c.bf16 %v137_v15, %v137_v15  ;;  %v109_v18 = vpop.f32.mrf.mxu0  ;;  %v119_v19 = vpop.f32.mrf.mxu1 }
  0x8c   :  { %v148_v20 = vpack.c.bf16 %v109_v18, %v109_v18  ;;  %v152_v21 = vpack.c.bf16 %v119_v19, %v119_v19 }
  0x8d   :  { %172 = vst.msk [vmem:[%s351_s2 + $0x20] sm:$0xf] %vm163_vm2, %v155_v16 }
  0x8e   :  { %176 = vst.msk [vmem:[%s351_s2 + $0x30] sm:$0xf] %vm163_vm2, %v159_v17 }
  0x8f   :  { %165 = vst.msk [vmem:[%s351_s2 + $0x4] sm:$0xf] %vm163_vm2, %v148_v20 }
  0x90   :  { %169 = vst.msk [vmem:[%s351_s2 + $0x14] sm:$0xf] %vm163_vm2, %v152_v21 }
  0x92   :  { %v129_v22 = vpop.f32.mrf.mxu2  ;;  %v139_v23 = vpop.f32.mrf.mxu3 }
  0x93   :  { %v156_v24 = vpack.c.bf16 %v129_v22, %v129_v22  ;;  %v160_v25 = vpack.c.bf16 %v139_v23, %v139_v23  ;;  %v112_v26 = vpop.f32.mrf.mxu0  ;;  %v122_v27 = vpop.f32.mrf.mxu1 }
  0x94   :  { %v149_v28 = vpack.c.bf16 %v112_v26, %v112_v26  ;;  %v153_v29 = vpack.c.bf16 %v122_v27, %v122_v27 }
  0x95   :  { %173 = vst.msk [vmem:[%s351_s2 + $0x24] sm:$0xf] %vm163_vm2, %v156_v24 }
  0x96   :  { %177 = vst.msk [vmem:[%s351_s2 + $0x34] sm:$0xf] %vm163_vm2, %v160_v25 }
  0x97   :  { %166 = vst.msk [vmem:[%s351_s2 + $0x8] sm:$0xf] %vm163_vm2, %v149_v28 }
  0x98   :  { %170 = vst.msk [vmem:[%s351_s2 + $0x18] sm:$0xf] %vm163_vm2, %v153_v29 }
  0x9a   :  { %v132_v30 = vpop.f32.mrf.mxu2  ;;  %v142_v31 = vpop.f32.mrf.mxu3 }
  0x9b   :  { %v157_v32 = vpack.c.bf16 %v132_v30, %v132_v30  ;;  %v161_v33 = vpack.c.bf16 %v142_v31, %v142_v31  ;;  %v114_v34 = vpop.f32.mrf.mxu0  ;;  %v124_v35 = vpop.f32.mrf.mxu1 }
  0x9c   :  { %v150_v36 = vpack.c.bf16 %v114_v34, %v114_v34  ;;  %v154_v37 = vpack.c.bf16 %v124_v35, %v124_v35 }
  0x9d   :  { %174 = vst.msk [vmem:[%s351_s2 + $0x28] sm:$0xf] %vm163_vm2, %v157_v32 }
  0x9e   :  { %178 = vst.msk [vmem:[%s351_s2 + $0x38] sm:$0xf] %vm163_vm2, %v161_v33 }
  0x9f   :  { %167 = vst.msk [vmem:[%s351_s2 + $0xc] sm:$0xf] %vm163_vm2, %v150_v36 }
  0xa0   :  { %171 = vst.msk [vmem:[%s351_s2 + $0x1c] sm:$0xf] %vm163_vm2, %v154_v37 }
  0xa2   :  { %v134_v38 = vpop.f32.mrf.mxu2  ;;  %v144_v39 = vpop.f32.mrf.mxu3 }
  0xa3   :  { %v158_v40 = vpack.c.bf16 %v134_v38, %v134_v38  ;;  %v162_v41 = vpack.c.bf16 %v144_v39, %v144_v39 }
  0xa5   :  { %175 = vst.msk [vmem:[%s351_s2 + $0x2c] sm:$0xf] %vm163_vm2, %v158_v40 }
  0xa6   :  { %179 = vst.msk [vmem:[%s351_s2 + $0x3c] sm:$0xf] %vm163_vm2, %v162_v41 }

</bundles_post_ra>
